<compile_context>
chip_gen: v7x
topology: tpu7x:2x2x1
jax: 0.10.0
libtpu: 0.0.40
codegen_flags: <defaults>
</compile_context>

<pallas_src>
import jax
import jax.numpy as jnp
from jax import lax
from jax.experimental import pallas as pl
from jax.experimental.pallas import tpu as pltpu


def _round_up(x: int, m: int) -> int:
    return ((x + m - 1) // m) * m


def _projector_kernel(x_ref, wfc_ref, bfc_ref, wcls_ref, bcls_ref, out_ref):
    # x_ref   : (2, TB, D)  bf16  stacked (x1, x2) batch tile
    # wfc_ref : (D, D)      bf16  fc weight, (in, out) layout, resident
    # bfc_ref : (1, D)      f32   fc bias, resident
    # wcls_ref: (2, D)      f32   cls weight halves (row0 -> x1, row1 -> x2)
    # bcls_ref: (1,)        f32   cls bias (SMEM scalar)
    # out_ref : (1, 1, TB)  f32   lane-dense output row for this tile
    _, tb, d = x_ref.shape

    # ---- fused fc for both branches: ONE (2*TB, D) @ (D, D) MXU matmul ------
    # (2, TB, D) -> (2*TB, D) is a layout-trivial merge (TB % 16 == 0, D full
    # minor dim): no VMEM copy, unlike the old in-kernel concatenate.
    x = x_ref[...].reshape(2 * tb, d)                        # bf16
    acc = jnp.dot(x, wfc_ref[...], preferred_element_type=jnp.float32)
    rep = jnp.maximum(acc + bfc_ref[...], 0.0)               # f32 bias + ReLU (VPU)

    # ---- cls layer: single VPU multiply + XLU lane reduce (no N=1 matmul) ---
    rep3 = rep.reshape(2, tb, d)                             # split major dim (free)
    prod = rep3 * wcls_ref[...][:, None, :]                  # (2, TB, D) f32
    part = jnp.sum(prod, axis=-1, keepdims=True)             # (2, TB, 1) lane reduce
    s_col = part[0] + part[1] + bcls_ref[0]                  # (TB, 1) per-row preds

    # ---- relayout sublane column -> lane-dense row for an unmasked store ----
    # One-hot select + sublane reduce (runs on idle VPU/XLU slots).
    # TODO(synk): replace with a direct (TB,1)->(1,TB) relayout/transpose when
    #             Mosaic supports this shape; saves the O(TB^2) select work.
    rows = lax.broadcasted_iota(jnp.int32, (tb, tb), 0)
    cols = lax.broadcasted_iota(jnp.int32, (tb, tb), 1)
    scat = jnp.where(rows == cols, s_col, 0.0)               # diag(s_col), (TB, TB)
    out_row = jnp.sum(scat, axis=0, keepdims=True)           # (1, TB) lane-dense
    out_ref[...] = out_row[None].astype(out_ref.dtype)       # (1, 1, TB)


def projector_forward(x1, x2, w_fc, b_fc, w_cls, b_cls, *, tb=None):
    """Projector forward pass.

    x1, x2 : (B, D) float inputs.
    w_fc   : (D, D)      fc weight in PyTorch (out, in) layout.
    b_fc   : (D,)        fc bias.
    w_cls  : (1, 2*D)    cls weight in PyTorch layout.
    b_cls  : (1,)        cls bias.
    Returns (B, 1) float32 predictions.
    """
    B, D = x1.shape
    assert x2.shape == (B, D)
    assert w_fc.shape == (D, D) and w_cls.shape[1] == 2 * D

    # ---- tiling / padding decisions -----------------------------------------
    Dp = _round_up(max(D, 128), 128)          # lane + MXU-K alignment
    if tb is None:
        # Big batch tiles amortize per-grid-step overhead; 2*tb multiple of 256
        # fills the MXU on v6e/v7x.  Shrink on v7x if the resident weight
        # pressures its 64 MiB VMEM.
        tb = 512 if B >= 512 else _round_up(B, 16)
    tb = max(16, _round_up(tb, 16))           # bf16 sublane packing
    Bp = _round_up(B, tb)
    num_tiles = Bp // tb
    if num_tiles > 1 and num_tiles % 2 == 1:  # even grid -> both v7x TCs busy
        num_tiles += 1
        Bp = num_tiles * tb

    # ---- wrapper-side layout prep (tiny one-time XLA ops) -------------------
    def pad2(a, r, c):
        return jnp.pad(a, ((0, r - a.shape[0]), (0, c - a.shape[1])))

    x1p = pad2(jnp.asarray(x1, jnp.float32).astype(jnp.bfloat16), Bp, Dp)
    x2p = pad2(jnp.asarray(x2, jnp.float32).astype(jnp.bfloat16), Bp, Dp)
    xs = jnp.stack([x1p, x2p], axis=0)                          # (2, Bp, Dp) bf16

    wfc_p = pad2(jnp.asarray(w_fc, jnp.float32).T, Dp, Dp).astype(jnp.bfloat16)
    bfc_p = pad2(jnp.asarray(b_fc, jnp.float32).reshape(1, D), 1, Dp)   # (1, Dp) f32
    wcls = jnp.asarray(w_cls, jnp.float32)
    wcls_p = jnp.concatenate(
        [pad2(wcls[:, :D], 1, Dp), pad2(wcls[:, D:], 1, Dp)], axis=0)   # (2, Dp) f32
    bcls_p = jnp.asarray(b_cls, jnp.float32).reshape(1)                 # (1,) SMEM

    # ---- VMEM budget: resident params (single-buffered) + streamed blocks ---
    resident = Dp * Dp * 2 + Dp * 4 + 2 * Dp * 4
    streamed = 2 * (2 * tb * Dp * 2)          # x block, double-buffered, bf16
    outbuf = 2 * (tb * 4)
    est = resident + streamed + outbuf
    vmem_limit = int(min(100 * 2**20, max(2 * est + (1 << 20), 16 * 2**20)))

    def _call(single_buffer: bool):
        def res_spec(shape):
            idx = lambda i, _n=len(shape): (0,) * _n
            if single_buffer:
                return pl.BlockSpec(shape, idx, pipeline_mode=pl.Buffered(1))
            return pl.BlockSpec(shape, idx)

        return pl.pallas_call(
            _projector_kernel,
            out_shape=jax.ShapeDtypeStruct((num_tiles, 1, tb), jnp.float32),
            grid=(num_tiles,),
            in_specs=[
                pl.BlockSpec((2, tb, Dp), lambda i: (0, i, 0)),   # x tiles (pipelined)
                res_spec((Dp, Dp)),                               # w_fc   (resident)
                res_spec((1, Dp)),                                # b_fc   (resident)
                res_spec((2, Dp)),                                # w_cls  (resident)
                pl.BlockSpec(memory_space=pltpu.MemorySpace.SMEM),  # b_cls scalar
            ],
            out_specs=pl.BlockSpec((1, 1, tb), lambda i: (i, 0, 0)),  # lane-dense row
            compiler_params=pltpu.CompilerParams(
                dimension_semantics=("parallel",),                # 2 TCs on v7x
                vmem_limit_bytes=vmem_limit,
            ),
        )(xs, wfc_p, bfc_p, wcls_p, bcls_p)

    try:
        out = _call(True)     # single-buffer the resident params (halves their VMEM)
    except Exception:
        out = _call(False)    # this jax version rejects Buffered(1): default buffering

    return out.reshape(-1)[:B].reshape(B, 1)


if __name__ == "__main__":
    B = 32          # batch (tb=16 below -> 2-step grid, exercises the pipeline)
    D = 32          # input_size (not a multiple of 128; wrapper zero-pads to 128)

    key = jax.random.PRNGKey(0)
    k_x1, k_x2, k_wfc, k_bfc, k_wcls, k_bcls = jax.random.split(key, 6)

    x1 = jax.random.normal(k_x1, (B, D), dtype=jnp.float32)
    x2 = jax.random.normal(k_x2, (B, D), dtype=jnp.float32)
    # Parameters in PyTorch nn.Linear layout.
    w_fc = jax.random.normal(k_wfc, (D, D), dtype=jnp.float32) / jnp.sqrt(D)
    b_fc = jax.random.normal(k_bfc, (D,), dtype=jnp.float32) * 0.1
    w_cls = jax.random.normal(k_wcls, (1, 2 * D), dtype=jnp.float32) / jnp.sqrt(2 * D)
    b_cls = jax.random.normal(k_bcls, (1,), dtype=jnp.float32) * 0.1

    pred = projector_forward(x1, x2, w_fc, b_fc, w_cls, b_cls, tb=16)
    pred = jax.block_until_ready(pred)
    assert pred.shape == (B, 1), pred.shape

    # Matched-precision reference (bf16 MXU matmul + f32 epilogue == kernel numerics).
    wt_b = w_fc.T.astype(jnp.bfloat16)
    r1 = jnp.maximum(jnp.dot(x1.astype(jnp.bfloat16), wt_b,
                             preferred_element_type=jnp.float32) + b_fc, 0.0)
    r2 = jnp.maximum(jnp.dot(x2.astype(jnp.bfloat16), wt_b,
                             preferred_element_type=jnp.float32) + b_fc, 0.0)
    wa, wb = w_cls[0, :D], w_cls[0, D:]
    ref_match = (jnp.sum(r1 * wa, axis=1, keepdims=True)
                 + jnp.sum(r2 * wb, axis=1, keepdims=True) + b_cls[0])
    assert jnp.allclose(pred, ref_match, atol=2e-3, rtol=2e-3), "mismatch vs bf16 ref"

    # PyTorch-equivalent all-f32 reference (loose tolerance for the bf16 MXU path).
    rep1 = jnp.maximum(x1 @ w_fc.T + b_fc, 0.0)
    rep2 = jnp.maximum(x2 @ w_fc.T + b_fc, 0.0)
    ref = jnp.concatenate([rep1, rep2], axis=1) @ w_cls.T + b_cls
    assert jnp.allclose(pred, ref, atol=1e-1, rtol=1e-1), "mismatch vs f32 reference"

    print("KERNEL_OK")
</pallas_src>

<mosaic_0001>
module attributes {stable_mosaic.version = 11 : i64} {
  func.func @_projector_kernel(%arg0: i32, %arg1: memref<2x16x128xbf16, #tpu.memory_space<vmem>>, %arg2: memref<128x128xbf16, #tpu.memory_space<vmem>>, %arg3: memref<1x128xf32, #tpu.memory_space<vmem>>, %arg4: memref<2x128xf32, #tpu.memory_space<vmem>>, %arg5: memref<1xf32, #tpu.memory_space<smem>>, %arg6: memref<1x1x16xf32, #tpu.memory_space<vmem>>) attributes {dimension_semantics = [#tpu.dimension_semantics<parallel>], iteration_bounds = array<i64: 2>, scalar_prefetch = 0 : i64, scratch_operands = 0 : i64, tpu.core_type = #tpu.core_type<tc>, window_params = [{transform_indices = @transform_0, window_bounds = array<i64: 2, 16, 128>}, {pipeline_mode = #tpu.pipeline_mode<synchronous>, transform_indices = @transform_1, window_bounds = array<i64: 128, 128>}, {pipeline_mode = #tpu.pipeline_mode<synchronous>, transform_indices = @transform_2, window_bounds = array<i64: 1, 128>}, {pipeline_mode = #tpu.pipeline_mode<synchronous>, transform_indices = @transform_3, window_bounds = array<i64: 2, 128>}, {transform_indices = @transform_4, window_bounds = array<i64: 1>}, {transform_indices = @transform_5, window_bounds = array<i64: 1, 1, 16>}]} {
    %c0 = arith.constant 0 : index
    %c0_0 = arith.constant 0 : index
    %c0_1 = arith.constant 0 : index
    %0 = vector.load %arg1[%c0, %c0_0, %c0_1] : memref<2x16x128xbf16, #tpu.memory_space<vmem>>, vector<2x16x128xbf16>
    %1 = vector.shape_cast %0 : vector<2x16x128xbf16> to vector<32x128xbf16>
    %c0_2 = arith.constant 0 : index
    %c0_3 = arith.constant 0 : index
    %2 = vector.load %arg2[%c0_2, %c0_3] : memref<128x128xbf16, #tpu.memory_space<vmem>>, vector<128x128xbf16>
    %cst = arith.constant dense<0.000000e+00> : vector<32x128xf32>
    %3 = tpu.matmul %1, %2, %cst {dimension_numbers = #tpu.dot_dimension_numbers<[1], [0], [0], [1], [0, 0, 1, 1], [], []>} : vector<32x128xbf16>, vector<128x128xbf16>, vector<32x128xf32> -> vector<32x128xf32>
    %c0_4 = arith.constant 0 : index
    %c0_5 = arith.constant 0 : index
    %4 = vector.load %arg3[%c0_4, %c0_5] : memref<1x128xf32, #tpu.memory_space<vmem>>, vector<1x128xf32>
    %5 = vector.broadcast %4 : vector<1x128xf32> to vector<32x128xf32>
    %6 = arith.addf %3, %5 : vector<32x128xf32>
    %cst_6 = arith.constant 0.000000e+00 : f32
    %7 = vector.broadcast %cst_6 : f32 to vector<32x128xf32>
    %8 = arith.maximumf %6, %7 : vector<32x128xf32>
    %9 = vector.shape_cast %8 : vector<32x128xf32> to vector<2x16x128xf32>
    %c0_7 = arith.constant 0 : index
    %c0_8 = arith.constant 0 : index
    %10 = vector.load %arg4[%c0_7, %c0_8] : memref<2x128xf32, #tpu.memory_space<vmem>>, vector<2x128xf32>
    %11 = vector.shape_cast %10 : vector<2x128xf32> to vector<2x1x128xf32>
    %12 = vector.broadcast %11 : vector<2x1x128xf32> to vector<2x16x128xf32>
    %13 = arith.mulf %9, %12 : vector<2x16x128xf32>
    %cst_9 = arith.constant dense<0.000000e+00> : vector<2x16xf32>
    %14 = vector.multi_reduction <add>, %13, %cst_9 [2] : vector<2x16x128xf32> to vector<2x16xf32>
    %15 = vector.shape_cast %14 : vector<2x16xf32> to vector<2x16x1xf32>
    %16 = vector.extract_strided_slice %15 {offsets = [0, 0, 0], sizes = [1, 16, 1], strides = [1, 1, 1]} : vector<2x16x1xf32> to vector<1x16x1xf32>
    %17 = vector.shape_cast %16 : vector<1x16x1xf32> to vector<16x1xf32>
    %18 = vector.extract_strided_slice %15 {offsets = [1, 0, 0], sizes = [1, 16, 1], strides = [1, 1, 1]} : vector<2x16x1xf32> to vector<1x16x1xf32>
    %19 = vector.shape_cast %18 : vector<1x16x1xf32> to vector<16x1xf32>
    %20 = arith.addf %17, %19 : vector<16x1xf32>
    %c0_10 = arith.constant 0 : index
    %21 = memref.load %arg5[%c0_10] : memref<1xf32, #tpu.memory_space<smem>>
    %22 = vector.broadcast %21 : f32 to vector<16x1xf32>
    %23 = arith.addf %20, %22 : vector<16x1xf32>
    %24 = tpu.iota {dimensions = array<i32: 0>} : vector<16x16xi32>
    %25 = tpu.iota {dimensions = array<i32: 1>} : vector<16x16xi32>
    %26 = arith.cmpi eq, %24, %25 : vector<16x16xi32>
    %cst_11 = arith.constant 0.000000e+00 : f32
    %27 = vector.shape_cast %23 : vector<16x1xf32> to vector<16x1xf32>
    %28 = vector.broadcast %27 : vector<16x1xf32> to vector<16x16xf32>
    %29 = vector.broadcast %cst_11 : f32 to vector<16x16xf32>
    %30 = arith.select %26, %28, %29 : vector<16x16xi1>, vector<16x16xf32>
    %cst_12 = arith.constant dense<0.000000e+00> : vector<16xf32>
    %31 = vector.multi_reduction <add>, %30, %cst_12 [0] : vector<16x16xf32> to vector<16xf32>
    %32 = vector.shape_cast %31 : vector<16xf32> to vector<1x16xf32>
    %33 = vector.shape_cast %32 : vector<1x16xf32> to vector<1x1x16xf32>
    %c0_13 = arith.constant 0 : index
    %c0_14 = arith.constant 0 : index
    %c0_15 = arith.constant 0 : index
    %34 = vector.load %arg6[%c0_13, %c0_14, %c0_15] : memref<1x1x16xf32, #tpu.memory_space<vmem>>, vector<1x1x16xf32>
    tpu.vector_store %arg6[%c0_13, %c0_14, %c0_15], %33 {strides = array<i32>} : memref<1x1x16xf32, #tpu.memory_space<vmem>>, vector<1x1x16xf32>,
    return
  }
  func.func @transform_0(%arg0: i32) -> (i32, i32, i32) {
    %c0_i32 = arith.constant 0 : i32
    %c0_i32_0 = arith.constant 0 : i32
    %c0_i32_1 = arith.constant 0 : i32
    return %c0_i32, %arg0, %c0_i32_0 : i32, i32, i32
  }
  func.func @transform_1(%arg0: i32) -> (i32, i32) {
    %c0_i32 = arith.constant 0 : i32
    %c0_i32_0 = arith.constant 0 : i32
    %c0_i32_1 = arith.constant 0 : i32
    return %c0_i32, %c0_i32_0 : i32, i32
  }
  func.func @transform_2(%arg0: i32) -> (i32, i32) {
    %c0_i32 = arith.constant 0 : i32
    %c0_i32_0 = arith.constant 0 : i32
    %c0_i32_1 = arith.constant 0 : i32
    return %c0_i32, %c0_i32_0 : i32, i32
  }
  func.func @transform_3(%arg0: i32) -> (i32, i32) {
    %c0_i32 = arith.constant 0 : i32
    %c0_i32_0 = arith.constant 0 : i32
    %c0_i32_1 = arith.constant 0 : i32
    return %c0_i32, %c0_i32_0 : i32, i32
  }
  func.func @transform_4(%arg0: i32) -> i32 {
    %c0_i32 = arith.constant 0 : i32
    %c0_i32_0 = arith.constant 0 : i32
    return %c0_i32 : i32
  }
  func.func @transform_5(%arg0: i32) -> (i32, i32, i32) {
    %c0_i32 = arith.constant 0 : i32
    %c0_i32_0 = arith.constant 0 : i32
    %c0_i32_1 = arith.constant 0 : i32
    return %arg0, %c0_i32, %c0_i32_0 : i32, i32, i32
  }
}

module attributes {stable_mosaic.version = 11 : i64} {
  func.func @_projector_kernel(%arg0: i32, %arg1: memref<2x16x128xbf16, #tpu.memory_space<vmem>>, %arg2: memref<128x128xbf16, #tpu.memory_space<vmem>>, %arg3: memref<1x128xf32, #tpu.memory_space<vmem>>, %arg4: memref<2x128xf32, #tpu.memory_space<vmem>>, %arg5: memref<1xf32, #tpu.memory_space<smem>>, %arg6: memref<1x1x16xf32, #tpu.memory_space<vmem>>) attributes {dimension_semantics = [#tpu.dimension_semantics<parallel>], iteration_bounds = array<i64: 2>, scalar_prefetch = 0 : i64, scratch_operands = 0 : i64, tpu.core_type = #tpu.core_type<tc>, window_params = [{transform_indices = @transform_0, window_bounds = array<i64: 2, 16, 128>}, {pipeline_mode = #tpu.pipeline_mode<synchronous>, transform_indices = @transform_1, window_bounds = array<i64: 128, 128>}, {pipeline_mode = #tpu.pipeline_mode<synchronous>, transform_indices = @transform_2, window_bounds = array<i64: 1, 128>}, {pipeline_mode = #tpu.pipeline_mode<synchronous>, transform_indices = @transform_3, window_bounds = array<i64: 2, 128>}, {transform_indices = @transform_4, window_bounds = array<i64: 1>}, {transform_indices = @transform_5, window_bounds = array<i64: 1, 1, 16>}]} {
    %c0 = arith.constant 0 : index
    %c0_0 = arith.constant 0 : index
    %c0_1 = arith.constant 0 : index
    %0 = vector.load %arg1[%c0, %c0_0, %c0_1] : memref<2x16x128xbf16, #tpu.memory_space<vmem>>, vector<2x16x128xbf16>
    %1 = vector.shape_cast %0 : vector<2x16x128xbf16> to vector<32x128xbf16>
    %c0_2 = arith.constant 0 : index
    %c0_3 = arith.constant 0 : index
    %2 = vector.load %arg2[%c0_2, %c0_3] : memref<128x128xbf16, #tpu.memory_space<vmem>>, vector<128x128xbf16>
    %cst = arith.constant dense<0.000000e+00> : vector<32x128xf32>
    %3 = tpu.matmul %1, %2, %cst {dimension_numbers = #tpu.dot_dimension_numbers<[1], [0], [0], [1], [0, 0, 1, 1], [], []>} : vector<32x128xbf16>, vector<128x128xbf16>, vector<32x128xf32> -> vector<32x128xf32>
    %c0_4 = arith.constant 0 : index
    %c0_5 = arith.constant 0 : index
    %4 = vector.load %arg3[%c0_4, %c0_5] : memref<1x128xf32, #tpu.memory_space<vmem>>, vector<1x128xf32>
    %5 = vector.broadcast %4 : vector<1x128xf32> to vector<32x128xf32>
    %6 = arith.addf %3, %5 : vector<32x128xf32>
    %cst_6 = arith.constant 0.000000e+00 : f32
    %7 = vector.broadcast %cst_6 : f32 to vector<32x128xf32>
    %8 = arith.maximumf %6, %7 : vector<32x128xf32>
    %9 = vector.shape_cast %8 : vector<32x128xf32> to vector<2x16x128xf32>
    %c0_7 = arith.constant 0 : index
    %c0_8 = arith.constant 0 : index
    %10 = vector.load %arg4[%c0_7, %c0_8] : memref<2x128xf32, #tpu.memory_space<vmem>>, vector<2x128xf32>
    %11 = vector.shape_cast %10 : vector<2x128xf32> to vector<2x1x128xf32>
    %12 = vector.broadcast %11 : vector<2x1x128xf32> to vector<2x16x128xf32>
    %13 = arith.mulf %9, %12 : vector<2x16x128xf32>
    %cst_9 = arith.constant dense<0.000000e+00> : vector<2x16xf32>
    %14 = vector.multi_reduction <add>, %13, %cst_9 [2] : vector<2x16x128xf32> to vector<2x16xf32>
    %15 = vector.shape_cast %14 : vector<2x16xf32> to vector<2x16x1xf32>
    %16 = vector.extract_strided_slice %15 {offsets = [0, 0, 0], sizes = [1, 16, 1], strides = [1, 1, 1]} : vector<2x16x1xf32> to vector<1x16x1xf32>
    %17 = vector.shape_cast %16 : vector<1x16x1xf32> to vector<16x1xf32>
    %18 = vector.extract_strided_slice %15 {offsets = [1, 0, 0], sizes = [1, 16, 1], strides = [1, 1, 1]} : vector<2x16x1xf32> to vector<1x16x1xf32>
    %19 = vector.shape_cast %18 : vector<1x16x1xf32> to vector<16x1xf32>
    %20 = arith.addf %17, %19 : vector<16x1xf32>
    %c0_10 = arith.constant 0 : index
    %21 = memref.load %arg5[%c0_10] : memref<1xf32, #tpu.memory_space<smem>>
    %22 = vector.broadcast %21 : f32 to vector<16x1xf32>
    %23 = arith.addf %20, %22 : vector<16x1xf32>
    %24 = tpu.iota {dimensions = array<i32: 0>} : vector<16x16xi32>
    %25 = tpu.iota {dimensions = array<i32: 1>} : vector<16x16xi32>
    %26 = arith.cmpi eq, %24, %25 : vector<16x16xi32>
    %cst_11 = arith.constant 0.000000e+00 : f32
    %27 = vector.shape_cast %23 : vector<16x1xf32> to vector<16x1xf32>
    %28 = vector.broadcast %27 : vector<16x1xf32> to vector<16x16xf32>
    %29 = vector.broadcast %cst_11 : f32 to vector<16x16xf32>
    %30 = arith.select %26, %28, %29 : vector<16x16xi1>, vector<16x16xf32>
    %cst_12 = arith.constant dense<0.000000e+00> : vector<16xf32>
    %31 = vector.multi_reduction <add>, %30, %cst_12 [0] : vector<16x16xf32> to vector<16xf32>
    %32 = vector.shape_cast %31 : vector<16xf32> to vector<1x16xf32>
    %33 = vector.shape_cast %32 : vector<1x16xf32> to vector<1x1x16xf32>
    %c0_13 = arith.constant 0 : index
    %c0_14 = arith.constant 0 : index
    %c0_15 = arith.constant 0 : index
    %34 = vector.load %arg6[%c0_13, %c0_14, %c0_15] : memref<1x1x16xf32, #tpu.memory_space<vmem>>, vector<1x1x16xf32>
    tpu.vector_store %arg6[%c0_13, %c0_14, %c0_15], %33 {strides = array<i32>} : memref<1x1x16xf32, #tpu.memory_space<vmem>>, vector<1x1x16xf32>,
    return
  }
  func.func @transform_0(%arg0: i32) -> (i32, i32, i32) {
    %c0_i32 = arith.constant 0 : i32
    %c0_i32_0 = arith.constant 0 : i32
    %c0_i32_1 = arith.constant 0 : i32
    return %c0_i32, %arg0, %c0_i32_0 : i32, i32, i32
  }
  func.func @transform_1(%arg0: i32) -> (i32, i32) {
    %c0_i32 = arith.constant 0 : i32
    %c0_i32_0 = arith.constant 0 : i32
    %c0_i32_1 = arith.constant 0 : i32
    return %c0_i32, %c0_i32_0 : i32, i32
  }
  func.func @transform_2(%arg0: i32) -> (i32, i32) {
    %c0_i32 = arith.constant 0 : i32
    %c0_i32_0 = arith.constant 0 : i32
    %c0_i32_1 = arith.constant 0 : i32
    return %c0_i32, %c0_i32_0 : i32, i32
  }
  func.func @transform_3(%arg0: i32) -> (i32, i32) {
    %c0_i32 = arith.constant 0 : i32
    %c0_i32_0 = arith.constant 0 : i32
    %c0_i32_1 = arith.constant 0 : i32
    return %c0_i32, %c0_i32_0 : i32, i32
  }
  func.func @transform_4(%arg0: i32) -> i32 {
    %c0_i32 = arith.constant 0 : i32
    %c0_i32_0 = arith.constant 0 : i32
    return %c0_i32 : i32
  }
  func.func @transform_5(%arg0: i32) -> (i32, i32, i32) {
    %c0_i32 = arith.constant 0 : i32
    %c0_i32_0 = arith.constant 0 : i32
    %c0_i32_1 = arith.constant 0 : i32
    return %arg0, %c0_i32, %c0_i32_0 : i32, i32, i32
  }
}

</mosaic_0001>

<bundles_post_ra>
// kernel: tpu_custom_call.1
= control target key start
LH: loop header
LB: loop body
LE: loop exit
PB: predicated region body
PF: predicated region fallthrough
CT: control target
= control target key end

     0   :  { %s1049_s0 = inlined_call_operand.hbm [shape: bf16[2,32,128], index: 0, kind: input, shape index: {}]   ;;  %s1050_s1 = inlined_call_operand.hbm [shape: bf16[128,128], index: 1, kind: input, shape index: {}]   ;;  %s1051_s2 = inlined_call_operand.vmem [shape: f32[1,128], index: 2, kind: input, shape index: {}]   ;;  %s1052_s3 = inlined_call_operand.vmem [shape: f32[2,128], index: 3, kind: input, shape index: {}]   ;;  %s1053_s4 = inlined_call_operand.<no memory space> [shape: f32[1], index: 4, kind: input, shape index: {}]   ;;  %s1054_s5 = inlined_call_operand.hbm [shape: f32[2,1,16], index: 5, kind: output, shape index: {}]  }
   0x1   :  { %10 = sst [smem:[#allocation2]] %s1053_s4 }
   0x2   :  { %11 = vsyncpa [#allocation4], 0 }
   0x3   :  { %13 = vsyncpa [#allocation4 + $0x1], 0 }
   0x4   :  { %14 = vsyncpa [#allocation7], 0 }
   0x5   :  { %15 = vsyncpa [#allocation5], 0 }
   0x6   :  { %17 = vsyncpa [#allocation5 + $0x1], 0  ;;  %s867_s20 = smov 0   ;;  %s869_s21 = smov 0  }
   0x7   :  { %s871_s22 = smov 0   ;;  %s873_s23 = smov 0  }
   0x8 LB: > { %s888_s4 = sadd.s32 4294967295, %s821_s23   ;;  %s587_s24 = sadd.s32 4294967294, %s821_s23   ;;  %s821_s23 = sphi %s873_s23, %s1076_s23   ;;  %s817_s22 = sphi %s871_s22, %s1075_s22   ;;  %s813_s21 = sphi %s869_s21, %s1074_s21   ;;  %s809_s20 = sphi %s867_s20, %s1073_s20  }
   0x9   : > { %s892_s25 = sadd.s32 1, %s821_s23   ;;  %s30_s26 = sadd.s32 1, %s817_s22 }
   0xa   : > { %s27_s27 = ssub.s32 %s821_s23, %s892_s25  ;;  %p37_p0 = scmp.ne.s32.totalorder %s817_s22, %s813_s21 }
   0xb   : > { %p28_p1 = scmp.eq.s32.totalorder %s27_s27, 0  ;;  %p38_p2 = scmp.eq.s32.totalorder %s821_s23, 0 }
   0xc   : > { %p43_p3 = scmp.ne.s32.totalorder %s813_s21, %s809_s20  ;;  %p1055_p4 = scmp.eq.s32.totalorder %s888_s4, 0 }
   0xd   : > { %s904_s28 = scalar_select %p28_p1, %s817_s22, %s30_s26  }
   0xe   : > { %p906_p5 = por %p38_p2, %p37_p0  ;;  %p912_p6 = por %p1055_p4, %p43_p3 }
   0xf   : > { %p151_p7 = scmp.eq.s32.totalorder %s888_s4, 1  ;;  %p157_p8 = scmp.eq.s32.totalorder %s587_s24, 1 }
  0x10   : > { %s1060_s29 = scalar_select %p906_p5, 1, 0 }
  0x11   : > { %s1061_s30 = scalar_select %p912_p6, 1, 0 }
  0x12   : > { %p588_p9 = scmp.ge.s32.totalorder %s821_s23, 1  ;;  %p164_p10 = scmp.lt.s32.totalorder %s821_s23, 3 }
  0x13   : > { %p919_p11 = por %p151_p7, %p37_p0  ;;  %p923_p12 = por %p157_p8, %p43_p3 }
  0x14   : > { %p927_p13 = pnand %p588_p9, %p164_p10  ;;  %s823_s9 = smov [#allocation6]  }
  0x15   : > { %s1062_s6 = scalar_select %p919_p11, 1, 0 }
  0x16   : > { %s1063_s7 = scalar_select %p923_p12, 1, 0 }
  0x17   : > { %s1064_s8 = scalar_select %p927_p13, 1, 0 }
  0x18   : > { %p660_p1 = pneg %p927_p13  ;;  %s176_s10 = sshll.u32 %s823_s9, 4  ;;  %s177_s10 = int_to_ptr.vmem [resolvable:$true] %s176_s10 }
  0x19   : > { %s723_s14 = scalar_lea.hbm %s1050_s1, 1024 }
  0x1a   : > { %p935_p2 = pnand %p660_p1, %p1055_p4  ;;  %p724_p0 = scmp.ne.s32.totalorder %s1050_s1, %s723_s14 }
  0x1b   : > { %p730_p9 = scmp.lt.u32.totalorder %s723_s14, %s1050_s1 }
  0x1c   : > { %p725_p3 = pneg %p935_p2 }
  0x1e   : > { %p726_p7 = pnand %p725_p3, %p724_p0 }
  0x20   : > { %p727_p8 = pneg %p726_p7 }
  0x22   : > { %p732_p10 = pnand %p730_p9, %p727_p8 }
  0x24   : > { %735 = shalt.err (!%p732_p10)
}
  0x25   : > { %s736_s19 = scalar_lea.vmem %s177_s10, 1024  ;;  %p744_p11 = scmp.lt.s32.totalorder %s177_s10, %s177_s10 }
  0x26   : > { %p737_p1 = scmp.ne.s32.totalorder %s177_s10, %s736_s19  ;;  %p745_p6 = scmp.lt.s32.totalorder %s736_s19, %s736_s19 }
  0x28   : > { %p739_p4 = pnand %p737_p1, %p725_p3  ;;  %p746_p13 = por %p745_p6, %p744_p11 }
  0x2a   : > { %p740_p12 = pneg %p739_p4 }
  0x2c   : > { %p747_p5 = pnand %p746_p13, %p740_p12 }
  0x2e   : > { %750 = shalt.err (!%p747_p5)
}
  0x2f   : > { %s824_s24 = smov 64   ;;  %s825_s26 = smov 4  }
  0x30   : > { %663 = dma.hbm_to_vmem [thread:$0]  (!%p935_p2), %s1050_s1, 1024, %s177_s10, [#allocation7], %s824_s24, %s824_s24, %s825_s26  }
  0x31   : > { %p590_p0 = scmp.ge.s32.totalorder %s821_s23, 2 }
  0x33   : > { %195 = sbr.rel (%p590_p0) target bundleno = 73 (0x49), region = 32 }
  0x3a   : > { %s199_s12 = sand.u32 1, %s817_s22   ;;  %s614_s13 = sshll.u32 %s821_s23, 7 }
  0x3b   : > { %s591_s11 = sshll.u32 %s199_s12, 4  ;;  %s209_s10 = scalar_lea.hbm %s1049_s0, %s614_s13 }
  0x3c   : > { %p1066_p4 = scmp.ne.s32.totalorder %s1060_s29, 0  ;;  %s203_s17 = scalar_lea.vmem [#allocation3], %s591_s11 }
  0x3d   : > { %s222_s18 = sshll.u32 %s203_s17, 4  ;;  %s826_s24 = smov 256   ;;  %s223_s18 = int_to_ptr.vmem [resolvable:$true] %s222_s18 }
  0x3e   : > { %s647_s16 = scalar_select %p1066_p4, [#allocation0], [#allocation11] }
  0x3f   : > { %648 = sst [smem:[#allocation10]] (%p1066_p4), %s826_s24  ;;  %s827_s26 = smov 128  }
  0x40   : > { %s214_s19 = sld [smem:[%s647_s16]]   ;;  %s828_s27 = smov 2  }
  0x41   : > { %649 = sst [smem:[#allocation10 + $0x1]] (%p1066_p4), %s827_s26  ;;  %s829_s9 = smov 64  }
  0x42   : > { %650 = sst [smem:[#allocation10 + $0x2]] (%p1066_p4), %s828_s27  ;;  %s830_s11 = smov 4  }
  0x43   : > { %651 = sst [smem:[#allocation10 + $0x3]] (%p1066_p4), %s829_s9  ;;  %s200_s15 = scalar_lea.sflag [#allocation4], %s199_s12 }
  0x44   : > { %652 = sst [smem:[#allocation10 + $0x4]] (%p1066_p4), %s829_s9  ;;  %s831_s16 = smov [#allocation9]  }
  0x45   : > { %653 = sst [smem:[#allocation10 + $0x5]] (%p1066_p4), %s830_s11 }
  0x46   : > { %s594_s13 = sshll.u32 %s214_s19, 26 }
  0x47   : > { %s595_s14 = sadd.s32 134217728, %s594_s13 }
  0x48   : > { %654 = dma.general (%p1066_p4), %s209_s10, 256, %s223_s18, %s200_s15, %s831_s16, [#allocation10], %s595_s14, 0  }
  0x49 PF: > { %p1067_p5 = scmp.ne.s32.totalorder %s1064_s8, 0 }
  0x4a   : > { %s982_s17 = sand.u32 (!%p1067_p5), 1, %s813_s21   ;;  %p1068_p6 = scmp.ne.s32.totalorder (!%p1067_p5), %s1061_s30, 0 }
  0x4b   : > { %247 = sbr.rel (%p1067_p5) target bundleno = 518 (0x206), region = 40  ;;  %s597_s24 = sshll.u32 (!%p1067_p5), %s982_s17, 4 }
  0x4c   : > { %s250_s19 = scalar_lea.sflag (!%p1067_p5), [#allocation4], %s982_s17  ;;  %s253_s26 = scalar_lea.vmem (!%p1067_p5), [#allocation3], %s597_s24 }
  0x52   : > { %796 = dma.done.wait (%p1068_p6), %s250_s19, 256  }
  0x53   : > { %798 = vsyncadd (%p1068_p6), %s250_s19, 4294967040  ;;  %p1069_p11 = scmp.eq.s32.totalorder %s888_s4, 0 }
  0x55   : > { %800 = dma.done.wait (%p1069_p11), [#allocation7], 1024   ;;  %p1070_p12 = pmov %p1069_p11 }
  0x56   : > { %v713_v0 = vld [vmem:[#allocation6] sm:$0xff]   ;;  %v714_v1 = vld [vmem:[#allocation6 + $0x8] sm:$0xff]   ;;  %v715_v2 = vld [vmem:[#allocation6 + $0x10] sm:$0xff]   ;;  %v832_v10 = vmov 1966171168   ;;  %v438_v12 = vlaneseq  ;;  %s473_s10 = sld [smem:[#allocation2]] }
  0x57   : > { %802 = vsyncadd (%p1070_p12), [#allocation7], 4294966272  ;;  %625 = vmatprep.subr.bf16.mxu0 %v713_v0  ;;  %v716_v3 = vld [vmem:[#allocation6 + $0x18] sm:$0xff]   ;;  %v721_v4 = vld [vmem:[%s253_s26] sm:$0xff]   ;;  %v436_v11 = vunpack.c.l.s4 %v832_v10  ;;  %vm486_vm2 = vcmask 130048   ;;  %s611_s18 = sshll.u32 %s888_s4, 4 }
  0x58   : > { %626 = vmatpush3.bf16.msra.mxu0 %v713_v0  ;;  %641 = vmatprep.mubr.bf16.mxu0 %v721_v4  ;;  %v717_v5 = vld [vmem:[#allocation6 + $0x20] sm:$0xff]   ;;  %v718_v6 = vld [vmem:[#allocation6 + $0x28] sm:$0xff]   ;;  %v719_v7 = vld [vmem:[#allocation6 + $0x30] sm:$0xff]   ;;  %v439_v14 = vshrl.u32 %v438_v12, 7  ;;  %v481_v42 = vand.u32 127, %v438_v12  ;;  %s282_s27 = scalar_lea.vmem [#allocation8], %s982_s17  ;;  %s1005_s14 = scalar_lea.hbm %s1054_s5, %s611_s18 }
  0x59   : > { %627 = vmatprep.subr.bf16.mxu0 %v714_v1  ;;  %v720_v8 = vld [vmem:[#allocation6 + $0x38] sm:$0xff]   ;;  %v437_v13 = vunpack.c.0.s8 %v436_v11  ;;  %v610_v15 = vld.sshfl [vmem:[%s1052_s3] sm:$0x11 pattern:$0x75316420]  ;;  %s511_s9 = sshll.u32 %s282_s27, 4  ;;  %s1007_s9 = int_to_ptr.vmem [resolvable:$true] %s511_s9 }
  0x5a   : > { %v722_v9 = vld [vmem:[%s253_s26 + $0x8] sm:$0xff]   ;;  %v434_v16 = vcombine.high %v610_v15, %v610_v15  ;;  %v451_v19 = vsub.s32 0, %v439_v14  ;;  %v599_v20 = vld [vmem:[%s1051_s2] ss:$0 sm:$0xff]  ;;  %v479_v45 = vadd.s32 8, %v439_v14  ;;  %vm482_vm0 = vcmp.eq.s32.totalorder %v439_v14, %v481_v42  ;;  %s499_s15 = scalar_lea.sflag [#allocation5], %s982_s17 }
  0x5b   : > { %v440_v17 = vsub.s32 %v437_v13, %v439_v14  ;;  %vm496_vm3 = vcmask 122880   ;;  %s751_s16 = scalar_lea.vmem %s1007_s9, 16  ;;  %p1071_p2 = scmp.ne.s32.totalorder %s1062_s6, 0 }
  0x5c   : > { %628 = vmatpush3.bf16.msra.mxu0 %v714_v1  ;;  %v474_v41 = vstv %s473_s10  ;;  %vm483_vm1 = vcmp.eq.s32.totalorder %v479_v45, %v481_v42  ;;  %p752_p13 = scmp.ne.s32.totalorder %s1007_s9, %s751_s16  ;;  %s833_s4 = smov [#allocation8]  }
  0x5d   : > { %629 = vmatprep.subr.bf16.mxu0 %v715_v2  ;;  %v448_v18 = vrot.slane %v434_v16, %v440_v17  ;;  %v441_v21 = vrot.slane %v610_v15, %v440_v17  ;;  %s755_s24 = sshll.u32 %s833_s4, 4  ;;  %s756_s24 = int_to_ptr.vmem [resolvable:$false] %s755_s24 }
  0x5e   : > { %p753_p3 = pnand %p752_p13, %p1071_p2  ;;  %s757_s19 = scalar_lea.vmem %s756_s24, 32 }
  0x5f   : > { %v456_v25 = vrot.slane %v448_v18, %v451_v19  ;;  %v452_v28 = vrot.slane %v441_v21, %v451_v19  ;;  %p758_p8 = scmp.lt.s32.totalorder %s1007_s9, %s756_s24  ;;  %p759_p9 = scmp.lt.s32.totalorder %s757_s19, %s751_s16 }
  0x60   : > { %630 = vmatpush3.bf16.msra.mxu0 %v715_v2  ;;  %p754_p7 = pneg %p753_p3 }
  0x61   : > { %631 = vmatprep.subr.bf16.mxu0 %v716_v3  ;;  %p760_p10 = por %p759_p9, %p758_p8 }
  0x63   : > { %p761_p1 = pnand %p760_p10, %p754_p7 }
  0x64   : > { %632 = vmatpush3.bf16.msra.mxu0 %v716_v3 }
  0x65   : > { %633 = vmatprep.subr.bf16.mxu0 %v717_v5 }
  0x68   : > { %634 = vmatpush3.bf16.msra.mxu0 %v717_v5 }
  0x69   : > { %635 = vmatprep.subr.bf16.mxu0 %v718_v6 }
  0x6c   : > { %636 = vmatpush3.bf16.msra.mxu0 %v718_v6 }
  0x6d   : > { %637 = vmatprep.subr.bf16.mxu0 %v719_v7 }
  0x70   : > { %638 = vmatpush3.bf16.msra.mxu0 %v719_v7 }
  0x71   : > { %639 = vmatprep.subr.bf16.mxu0 %v720_v8 }
  0x74   : > { %640 = vmatpush3.bf16.msra.mxu0 %v720_v8 }
  0x77   : > { %642 = vmatmul.mubr.bf16.vlgmr.msra.gmra.mrb[0].mxu0 %v722_v9 }
 0x14a   : > { %v643_v22 = vpop.f32.mrb[0].mxu0 }
 0x14b   : > { %v415_v23 = vadd.f32 %v643_v22, %v599_v20  ;;  %v406_v24 = vpop.f32.mrb[1].mxu0 }
 0x14c   : > { %v407_v26 = vadd.f32 %v599_v20, %v406_v24  ;;  %v644_v27 = vpop.f32.mrb[2].mxu0 }
 0x14d   : > { %v423_v29 = vmax.f32 %v415_v23, 0.0  ;;  %v418_v30 = vadd.f32 %v644_v27, %v599_v20  ;;  %v409_v31 = vpop.f32.mrb[3].mxu0 }
 0x14e   : > { %v421_v32 = vmax.f32 %v407_v26, 0.0  ;;  %v410_v33 = vadd.f32 %v599_v20, %v409_v31 }
 0x14f   : > { %v424_v34 = vmax.f32 %v418_v30, 0.0  ;;  %v461_v35 = vmul.f32 %v456_v25, %v423_v29 }
 0x150   : > { %v422_v36 = vmax.f32 %v410_v33, 0.0  ;;  %v459_v37 = vmul.f32 %v452_v28, %v421_v32 }
 0x151   : > { %467 = vadd.xlane.f32.xlu1 %v461_v35  ;;  %v462_v38 = vmul.f32 %v456_v25, %v424_v34 }
 0x152   : > { %463 = vadd.xlane.f32.xlu0 %v459_v37  ;;  %v460_v39 = vmul.f32 %v452_v28, %v422_v36 }
 0x155   : > { %469 = vadd.xlane.f32.xlu1 %v462_v38 }
 0x156   : > { %465 = vadd.xlane.f32.xlu0 %v460_v39 }
 0x1de   : > { %v468_v40 = vpop.xlane.xlu1 %467 }
 0x1df   : > { %v464_v43 = vpop.xlane.xlu0 %463 }
 0x1e0   : > { %v471_v44 = vadd.f32 %v468_v40, %v464_v43 }
 0x1e2   : > { %v475_v46 = vadd.f32 %v474_v41, %v471_v44  ;;  %v470_v47 = vpop.xlane.xlu1 %469 }
 0x1e3   : > { %v466_v48 = vpop.xlane.xlu0 %465 }
 0x1e4   : > { %v472_v49 = vadd.f32 %v470_v47, %v466_v48  ;;  %v484_v50 = vsel %vm482_vm0, %v475_v46, 0.0 }
 0x1e5   : > { %v487_v53 = vsel %vm486_vm2, %v484_v50, 0.0 }
 0x1e6   : > { %v476_v51 = vadd.f32 %v474_v41, %v472_v49 }
 0x1e8   : > { %v485_v52 = vsel %vm483_vm1, %v476_v51, 0.0 }
 0x1e9   : > { %v488_v54 = vsel %vm486_vm2, %v485_v52, 0.0 }
 0x1ea   : > { %v489_v55 = vadd.f32 %v488_v54, %v487_v53 }
 0x1ec   : > { %v490_v56 = vrot.slane %v489_v55, 4 }
 0x1ee   : > { %v491_v57 = vadd.f32 %v490_v56, %v489_v55 }
 0x1f0   : > { %v492_v58 = vrot.slane %v491_v57, 2 }
 0x1f2   : > { %v493_v59 = vadd.f32 %v492_v58, %v491_v57 }
 0x1f4   : > { %v494_v60 = vrot.slane %v493_v59, 1 }
 0x1f6   : > { %v495_v61 = vadd.f32 %v494_v60, %v493_v59 }
 0x1f8   : > { %497 = vst.msk [vmem:[%s282_s27] sm:$0x1] %vm496_vm3, %v495_v61 }
 0x1f9   : > { %764 = shalt.err (!%p761_p1)
}
 0x1fa   : > { %s765_s17 = scalar_lea.hbm %s1005_s14, 16  ;;  %s769_s30 = scalar_lea.hbm %s1054_s5, 32 }
 0x1fb   : > { %p766_p4 = scmp.ne.s32.totalorder %s1005_s14, %s765_s17  ;;  %p770_p11 = scmp.lt.u32.totalorder %s1005_s14, %s1054_s5 }
 0x1fc   : > { %p771_p12 = scmp.lt.u32.totalorder %s769_s30, %s765_s17  ;;  %p773_p3 = scmp.lt.u32.totalorder %s765_s17, %s1005_s14 }
 0x1fd   : > { %p767_p5 = pnand %p766_p4, %p1071_p2 }
 0x1fe   : > { %p772_p13 = por %p771_p12, %p770_p11 }
 0x1ff   : > { %p768_p6 = pneg %p767_p5 }
 0x200   : > { %p774_p7 = por %p773_p3, %p772_p13 }
 0x202   : > { %p775_p8 = pnand %p774_p7, %p768_p6 }
 0x204   : > { %778 = shalt.err (!%p775_p8)
}
 0x205   : > { %658 = dma.vmem_to_hbm [thread:$0]  (%p1071_p2), %s1007_s9, 16, %s1005_s14, %s499_s15  }
 0x206 PF: > { %s523_s10 = sand.u32 1, %s809_s20   ;;  %p1072_p9 = scmp.ne.s32.totalorder %s1063_s7, 0 }
 0x207   : > { %s524_s18 = scalar_lea.sflag [#allocation5], %s523_s10 }
 0x208   : > { %p665_p10 = pnand %p590_p0, %p1072_p9 }
 0x20a   : > { %804 = dma.done.wait (!%p665_p10), %s524_s18, 16  }
 0x20b   : > { %806 = vsyncadd (!%p665_p10), %s524_s18, 4294967280  ;;  %p20_p1 = scmp.ge.s32.totalorder %s892_s25, 4   ;;  %s1073_s20 = smov %s813_s21 }
 0x20c   : > { %s1074_s21 = smov %s817_s22  ;;  %s1075_s22 = smov %s904_s28 }
 0x20d   : > { %s1076_s23 = smov %s892_s25  ;;  %22 = sbr.rel (!%p20_p1) target bundleno = 8 (0x8), region = 94 }
 0x214   :  { %528 = vsyncpa [#allocation4], 1 }
 0x215   :  { %530 = vsyncpa [#allocation4 + $0x1], 1 }
 0x216   :  { %531 = vsyncpa [#allocation7], 1 }
 0x217   :  { %532 = vsyncpa [#allocation5], 1 }
 0x218   :  { %534 = vsyncpa [#allocation5 + $0x1], 1 }

// kernel: tpu_custom_call.1
= control target key start
LH: loop header
LB: loop body
LE: loop exit
PB: predicated region body
PF: predicated region fallthrough
CT: control target
= control target key end

     0   :  { %s1049_s0 = inlined_call_operand.hbm [shape: bf16[2,32,128], index: 0, kind: input, shape index: {}]   ;;  %s1050_s1 = inlined_call_operand.hbm [shape: bf16[128,128], index: 1, kind: input, shape index: {}]   ;;  %s1051_s2 = inlined_call_operand.vmem [shape: f32[1,128], index: 2, kind: input, shape index: {}]   ;;  %s1052_s3 = inlined_call_operand.vmem [shape: f32[2,128], index: 3, kind: input, shape index: {}]   ;;  %s1053_s4 = inlined_call_operand.<no memory space> [shape: f32[1], index: 4, kind: input, shape index: {}]   ;;  %s1054_s5 = inlined_call_operand.hbm [shape: f32[2,1,16], index: 5, kind: output, shape index: {}]  }
   0x1   :  { %10 = sst [smem:[#allocation2]] %s1053_s4 }
   0x2   :  { %11 = vsyncpa [#allocation4], 0 }
   0x3   :  { %13 = vsyncpa [#allocation4 + $0x1], 0 }
   0x4   :  { %14 = vsyncpa [#allocation7], 0 }
   0x5   :  { %15 = vsyncpa [#allocation5], 0 }
   0x6   :  { %17 = vsyncpa [#allocation5 + $0x1], 0  ;;  %s867_s20 = smov 0   ;;  %s869_s21 = smov 0  }
   0x7   :  { %s871_s22 = smov 0   ;;  %s873_s23 = smov 0  }
   0x8 LB: > { %s888_s4 = sadd.s32 4294967295, %s821_s23   ;;  %s587_s24 = sadd.s32 4294967294, %s821_s23   ;;  %s821_s23 = sphi %s873_s23, %s1076_s23   ;;  %s817_s22 = sphi %s871_s22, %s1075_s22   ;;  %s813_s21 = sphi %s869_s21, %s1074_s21   ;;  %s809_s20 = sphi %s867_s20, %s1073_s20  }
   0x9   : > { %s892_s25 = sadd.s32 1, %s821_s23   ;;  %s30_s26 = sadd.s32 1, %s817_s22 }
   0xa   : > { %s27_s27 = ssub.s32 %s821_s23, %s892_s25  ;;  %p37_p0 = scmp.ne.s32.totalorder %s817_s22, %s813_s21 }
   0xb   : > { %p28_p1 = scmp.eq.s32.totalorder %s27_s27, 0  ;;  %p38_p2 = scmp.eq.s32.totalorder %s821_s23, 0 }
   0xc   : > { %p43_p3 = scmp.ne.s32.totalorder %s813_s21, %s809_s20  ;;  %p1055_p4 = scmp.eq.s32.totalorder %s888_s4, 0 }
   0xd   : > { %s904_s28 = scalar_select %p28_p1, %s817_s22, %s30_s26  }
   0xe   : > { %p906_p5 = por %p38_p2, %p37_p0  ;;  %p912_p6 = por %p1055_p4, %p43_p3 }
   0xf   : > { %p151_p7 = scmp.eq.s32.totalorder %s888_s4, 1  ;;  %p157_p8 = scmp.eq.s32.totalorder %s587_s24, 1 }
  0x10   : > { %s1060_s29 = scalar_select %p906_p5, 1, 0 }
  0x11   : > { %s1061_s30 = scalar_select %p912_p6, 1, 0 }
  0x12   : > { %p588_p9 = scmp.ge.s32.totalorder %s821_s23, 1  ;;  %p164_p10 = scmp.lt.s32.totalorder %s821_s23, 3 }
  0x13   : > { %p919_p11 = por %p151_p7, %p37_p0  ;;  %p923_p12 = por %p157_p8, %p43_p3 }
  0x14   : > { %p927_p13 = pnand %p588_p9, %p164_p10  ;;  %s823_s9 = smov [#allocation6]  }
  0x15   : > { %s1062_s6 = scalar_select %p919_p11, 1, 0 }
  0x16   : > { %s1063_s7 = scalar_select %p923_p12, 1, 0 }
  0x17   : > { %s1064_s8 = scalar_select %p927_p13, 1, 0 }
  0x18   : > { %p660_p1 = pneg %p927_p13  ;;  %s176_s10 = sshll.u32 %s823_s9, 4  ;;  %s177_s10 = int_to_ptr.vmem [resolvable:$true] %s176_s10 }
  0x19   : > { %s723_s14 = scalar_lea.hbm %s1050_s1, 1024 }
  0x1a   : > { %p935_p2 = pnand %p660_p1, %p1055_p4  ;;  %p724_p0 = scmp.ne.s32.totalorder %s1050_s1, %s723_s14 }
  0x1b   : > { %p730_p9 = scmp.lt.u32.totalorder %s723_s14, %s1050_s1 }
  0x1c   : > { %p725_p3 = pneg %p935_p2 }
  0x1e   : > { %p726_p7 = pnand %p725_p3, %p724_p0 }
  0x20   : > { %p727_p8 = pneg %p726_p7 }
  0x22   : > { %p732_p10 = pnand %p730_p9, %p727_p8 }
  0x24   : > { %735 = shalt.err (!%p732_p10)
}
  0x25   : > { %s736_s19 = scalar_lea.vmem %s177_s10, 1024  ;;  %p744_p11 = scmp.lt.s32.totalorder %s177_s10, %s177_s10 }
  0x26   : > { %p737_p1 = scmp.ne.s32.totalorder %s177_s10, %s736_s19  ;;  %p745_p6 = scmp.lt.s32.totalorder %s736_s19, %s736_s19 }
  0x28   : > { %p739_p4 = pnand %p737_p1, %p725_p3  ;;  %p746_p13 = por %p745_p6, %p744_p11 }
  0x2a   : > { %p740_p12 = pneg %p739_p4 }
  0x2c   : > { %p747_p5 = pnand %p746_p13, %p740_p12 }
  0x2e   : > { %750 = shalt.err (!%p747_p5)
}
  0x2f   : > { %s824_s24 = smov 64   ;;  %s825_s26 = smov 4  }
  0x30   : > { %663 = dma.hbm_to_vmem [thread:$0]  (!%p935_p2), %s1050_s1, 1024, %s177_s10, [#allocation7], %s824_s24, %s824_s24, %s825_s26  }
  0x31   : > { %p590_p0 = scmp.ge.s32.totalorder %s821_s23, 2 }
  0x33   : > { %195 = sbr.rel (%p590_p0) target bundleno = 73 (0x49), region = 32 }
  0x3a   : > { %s199_s12 = sand.u32 1, %s817_s22   ;;  %s614_s13 = sshll.u32 %s821_s23, 7 }
  0x3b   : > { %s591_s11 = sshll.u32 %s199_s12, 4  ;;  %s209_s10 = scalar_lea.hbm %s1049_s0, %s614_s13 }
  0x3c   : > { %p1066_p4 = scmp.ne.s32.totalorder %s1060_s29, 0  ;;  %s203_s17 = scalar_lea.vmem [#allocation3], %s591_s11 }
  0x3d   : > { %s222_s18 = sshll.u32 %s203_s17, 4  ;;  %s826_s24 = smov 256   ;;  %s223_s18 = int_to_ptr.vmem [resolvable:$true] %s222_s18 }
  0x3e   : > { %s647_s16 = scalar_select %p1066_p4, [#allocation0], [#allocation11] }
  0x3f   : > { %648 = sst [smem:[#allocation10]] (%p1066_p4), %s826_s24  ;;  %s827_s26 = smov 128  }
  0x40   : > { %s214_s19 = sld [smem:[%s647_s16]]   ;;  %s828_s27 = smov 2  }
  0x41   : > { %649 = sst [smem:[#allocation10 + $0x1]] (%p1066_p4), %s827_s26  ;;  %s829_s9 = smov 64  }
  0x42   : > { %650 = sst [smem:[#allocation10 + $0x2]] (%p1066_p4), %s828_s27  ;;  %s830_s11 = smov 4  }
  0x43   : > { %651 = sst [smem:[#allocation10 + $0x3]] (%p1066_p4), %s829_s9  ;;  %s200_s15 = scalar_lea.sflag [#allocation4], %s199_s12 }
  0x44   : > { %652 = sst [smem:[#allocation10 + $0x4]] (%p1066_p4), %s829_s9  ;;  %s831_s16 = smov [#allocation9]  }
  0x45   : > { %653 = sst [smem:[#allocation10 + $0x5]] (%p1066_p4), %s830_s11 }
  0x46   : > { %s594_s13 = sshll.u32 %s214_s19, 26 }
  0x47   : > { %s595_s14 = sadd.s32 134217728, %s594_s13 }
  0x48   : > { %654 = dma.general (%p1066_p4), %s209_s10, 256, %s223_s18, %s200_s15, %s831_s16, [#allocation10], %s595_s14, 0  }
  0x49 PF: > { %p1067_p5 = scmp.ne.s32.totalorder %s1064_s8, 0 }
  0x4a   : > { %s982_s17 = sand.u32 (!%p1067_p5), 1, %s813_s21   ;;  %p1068_p6 = scmp.ne.s32.totalorder (!%p1067_p5), %s1061_s30, 0 }
  0x4b   : > { %247 = sbr.rel (%p1067_p5) target bundleno = 518 (0x206), region = 40  ;;  %s597_s24 = sshll.u32 (!%p1067_p5), %s982_s17, 4 }
  0x4c   : > { %s250_s19 = scalar_lea.sflag (!%p1067_p5), [#allocation4], %s982_s17  ;;  %s253_s26 = scalar_lea.vmem (!%p1067_p5), [#allocation3], %s597_s24 }
  0x52   : > { %796 = dma.done.wait (%p1068_p6), %s250_s19, 256  }
  0x53   : > { %798 = vsyncadd (%p1068_p6), %s250_s19, 4294967040  ;;  %p1069_p11 = scmp.eq.s32.totalorder %s888_s4, 0 }
  0x55   : > { %800 = dma.done.wait (%p1069_p11), [#allocation7], 1024   ;;  %p1070_p12 = pmov %p1069_p11 }
  0x56   : > { %v713_v0 = vld [vmem:[#allocation6] sm:$0xff]   ;;  %v714_v1 = vld [vmem:[#allocation6 + $0x8] sm:$0xff]   ;;  %v715_v2 = vld [vmem:[#allocation6 + $0x10] sm:$0xff]   ;;  %v832_v10 = vmov 1966171168   ;;  %v438_v12 = vlaneseq  ;;  %s473_s10 = sld [smem:[#allocation2]] }
  0x57   : > { %802 = vsyncadd (%p1070_p12), [#allocation7], 4294966272  ;;  %625 = vmatprep.subr.bf16.mxu0 %v713_v0  ;;  %v716_v3 = vld [vmem:[#allocation6 + $0x18] sm:$0xff]   ;;  %v721_v4 = vld [vmem:[%s253_s26] sm:$0xff]   ;;  %v436_v11 = vunpack.c.l.s4 %v832_v10  ;;  %vm486_vm2 = vcmask 130048   ;;  %s611_s18 = sshll.u32 %s888_s4, 4 }
  0x58   : > { %626 = vmatpush3.bf16.msra.mxu0 %v713_v0  ;;  %641 = vmatprep.mubr.bf16.mxu0 %v721_v4  ;;  %v717_v5 = vld [vmem:[#allocation6 + $0x20] sm:$0xff]   ;;  %v718_v6 = vld [vmem:[#allocation6 + $0x28] sm:$0xff]   ;;  %v719_v7 = vld [vmem:[#allocation6 + $0x30] sm:$0xff]   ;;  %v439_v14 = vshrl.u32 %v438_v12, 7  ;;  %v481_v42 = vand.u32 127, %v438_v12  ;;  %s282_s27 = scalar_lea.vmem [#allocation8], %s982_s17  ;;  %s1005_s14 = scalar_lea.hbm %s1054_s5, %s611_s18 }
  0x59   : > { %627 = vmatprep.subr.bf16.mxu0 %v714_v1  ;;  %v720_v8 = vld [vmem:[#allocation6 + $0x38] sm:$0xff]   ;;  %v437_v13 = vunpack.c.0.s8 %v436_v11  ;;  %v610_v15 = vld.sshfl [vmem:[%s1052_s3] sm:$0x11 pattern:$0x75316420]  ;;  %s511_s9 = sshll.u32 %s282_s27, 4  ;;  %s1007_s9 = int_to_ptr.vmem [resolvable:$true] %s511_s9 }
  0x5a   : > { %v722_v9 = vld [vmem:[%s253_s26 + $0x8] sm:$0xff]   ;;  %v434_v16 = vcombine.high %v610_v15, %v610_v15  ;;  %v451_v19 = vsub.s32 0, %v439_v14  ;;  %v599_v20 = vld [vmem:[%s1051_s2] ss:$0 sm:$0xff]  ;;  %v479_v45 = vadd.s32 8, %v439_v14  ;;  %vm482_vm0 = vcmp.eq.s32.totalorder %v439_v14, %v481_v42  ;;  %s499_s15 = scalar_lea.sflag [#allocation5], %s982_s17 }
  0x5b   : > { %v440_v17 = vsub.s32 %v437_v13, %v439_v14  ;;  %vm496_vm3 = vcmask 122880   ;;  %s751_s16 = scalar_lea.vmem %s1007_s9, 16  ;;  %p1071_p2 = scmp.ne.s32.totalorder %s1062_s6, 0 }
  0x5c   : > { %628 = vmatpush3.bf16.msra.mxu0 %v714_v1  ;;  %v474_v41 = vstv %s473_s10  ;;  %vm483_vm1 = vcmp.eq.s32.totalorder %v479_v45, %v481_v42  ;;  %p752_p13 = scmp.ne.s32.totalorder %s1007_s9, %s751_s16  ;;  %s833_s4 = smov [#allocation8]  }
  0x5d   : > { %629 = vmatprep.subr.bf16.mxu0 %v715_v2  ;;  %v448_v18 = vrot.slane %v434_v16, %v440_v17  ;;  %v441_v21 = vrot.slane %v610_v15, %v440_v17  ;;  %s755_s24 = sshll.u32 %s833_s4, 4  ;;  %s756_s24 = int_to_ptr.vmem [resolvable:$false] %s755_s24 }
  0x5e   : > { %p753_p3 = pnand %p752_p13, %p1071_p2  ;;  %s757_s19 = scalar_lea.vmem %s756_s24, 32 }
  0x5f   : > { %v456_v25 = vrot.slane %v448_v18, %v451_v19  ;;  %v452_v28 = vrot.slane %v441_v21, %v451_v19  ;;  %p758_p8 = scmp.lt.s32.totalorder %s1007_s9, %s756_s24  ;;  %p759_p9 = scmp.lt.s32.totalorder %s757_s19, %s751_s16 }
  0x60   : > { %630 = vmatpush3.bf16.msra.mxu0 %v715_v2  ;;  %p754_p7 = pneg %p753_p3 }
  0x61   : > { %631 = vmatprep.subr.bf16.mxu0 %v716_v3  ;;  %p760_p10 = por %p759_p9, %p758_p8 }
  0x63   : > { %p761_p1 = pnand %p760_p10, %p754_p7 }
  0x64   : > { %632 = vmatpush3.bf16.msra.mxu0 %v716_v3 }
  0x65   : > { %633 = vmatprep.subr.bf16.mxu0 %v717_v5 }
  0x68   : > { %634 = vmatpush3.bf16.msra.mxu0 %v717_v5 }
  0x69   : > { %635 = vmatprep.subr.bf16.mxu0 %v718_v6 }
  0x6c   : > { %636 = vmatpush3.bf16.msra.mxu0 %v718_v6 }
  0x6d   : > { %637 = vmatprep.subr.bf16.mxu0 %v719_v7 }
  0x70   : > { %638 = vmatpush3.bf16.msra.mxu0 %v719_v7 }
  0x71   : > { %639 = vmatprep.subr.bf16.mxu0 %v720_v8 }
  0x74   : > { %640 = vmatpush3.bf16.msra.mxu0 %v720_v8 }
  0x77   : > { %642 = vmatmul.mubr.bf16.vlgmr.msra.gmra.mrb[0].mxu0 %v722_v9 }
 0x14a   : > { %v643_v22 = vpop.f32.mrb[0].mxu0 }
 0x14b   : > { %v415_v23 = vadd.f32 %v643_v22, %v599_v20  ;;  %v406_v24 = vpop.f32.mrb[1].mxu0 }
 0x14c   : > { %v407_v26 = vadd.f32 %v599_v20, %v406_v24  ;;  %v644_v27 = vpop.f32.mrb[2].mxu0 }
 0x14d   : > { %v423_v29 = vmax.f32 %v415_v23, 0.0  ;;  %v418_v30 = vadd.f32 %v644_v27, %v599_v20  ;;  %v409_v31 = vpop.f32.mrb[3].mxu0 }
 0x14e   : > { %v421_v32 = vmax.f32 %v407_v26, 0.0  ;;  %v410_v33 = vadd.f32 %v599_v20, %v409_v31 }
 0x14f   : > { %v424_v34 = vmax.f32 %v418_v30, 0.0  ;;  %v461_v35 = vmul.f32 %v456_v25, %v423_v29 }
 0x150   : > { %v422_v36 = vmax.f32 %v410_v33, 0.0  ;;  %v459_v37 = vmul.f32 %v452_v28, %v421_v32 }
 0x151   : > { %467 = vadd.xlane.f32.xlu1 %v461_v35  ;;  %v462_v38 = vmul.f32 %v456_v25, %v424_v34 }
 0x152   : > { %463 = vadd.xlane.f32.xlu0 %v459_v37  ;;  %v460_v39 = vmul.f32 %v452_v28, %v422_v36 }
 0x155   : > { %469 = vadd.xlane.f32.xlu1 %v462_v38 }
 0x156   : > { %465 = vadd.xlane.f32.xlu0 %v460_v39 }
 0x1de   : > { %v468_v40 = vpop.xlane.xlu1 %467 }
 0x1df   : > { %v464_v43 = vpop.xlane.xlu0 %463 }
 0x1e0   : > { %v471_v44 = vadd.f32 %v468_v40, %v464_v43 }
 0x1e2   : > { %v475_v46 = vadd.f32 %v474_v41, %v471_v44  ;;  %v470_v47 = vpop.xlane.xlu1 %469 }
 0x1e3   : > { %v466_v48 = vpop.xlane.xlu0 %465 }
 0x1e4   : > { %v472_v49 = vadd.f32 %v470_v47, %v466_v48  ;;  %v484_v50 = vsel %vm482_vm0, %v475_v46, 0.0 }
 0x1e5   : > { %v487_v53 = vsel %vm486_vm2, %v484_v50, 0.0 }
 0x1e6   : > { %v476_v51 = vadd.f32 %v474_v41, %v472_v49 }
 0x1e8   : > { %v485_v52 = vsel %vm483_vm1, %v476_v51, 0.0 }
 0x1e9   : > { %v488_v54 = vsel %vm486_vm2, %v485_v52, 0.0 }
 0x1ea   : > { %v489_v55 = vadd.f32 %v488_v54, %v487_v53 }
 0x1ec   : > { %v490_v56 = vrot.slane %v489_v55, 4 }
 0x1ee   : > { %v491_v57 = vadd.f32 %v490_v56, %v489_v55 }
 0x1f0   : > { %v492_v58 = vrot.slane %v491_v57, 2 }
 0x1f2   : > { %v493_v59 = vadd.f32 %v492_v58, %v491_v57 }
 0x1f4   : > { %v494_v60 = vrot.slane %v493_v59, 1 }
 0x1f6   : > { %v495_v61 = vadd.f32 %v494_v60, %v493_v59 }
 0x1f8   : > { %497 = vst.msk [vmem:[%s282_s27] sm:$0x1] %vm496_vm3, %v495_v61 }
 0x1f9   : > { %764 = shalt.err (!%p761_p1)
}
 0x1fa   : > { %s765_s17 = scalar_lea.hbm %s1005_s14, 16  ;;  %s769_s30 = scalar_lea.hbm %s1054_s5, 32 }
 0x1fb   : > { %p766_p4 = scmp.ne.s32.totalorder %s1005_s14, %s765_s17  ;;  %p770_p11 = scmp.lt.u32.totalorder %s1005_s14, %s1054_s5 }
 0x1fc   : > { %p771_p12 = scmp.lt.u32.totalorder %s769_s30, %s765_s17  ;;  %p773_p3 = scmp.lt.u32.totalorder %s765_s17, %s1005_s14 }
 0x1fd   : > { %p767_p5 = pnand %p766_p4, %p1071_p2 }
 0x1fe   : > { %p772_p13 = por %p771_p12, %p770_p11 }
 0x1ff   : > { %p768_p6 = pneg %p767_p5 }
 0x200   : > { %p774_p7 = por %p773_p3, %p772_p13 }
 0x202   : > { %p775_p8 = pnand %p774_p7, %p768_p6 }
 0x204   : > { %778 = shalt.err (!%p775_p8)
}
 0x205   : > { %658 = dma.vmem_to_hbm [thread:$0]  (%p1071_p2), %s1007_s9, 16, %s1005_s14, %s499_s15  }
 0x206 PF: > { %s523_s10 = sand.u32 1, %s809_s20   ;;  %p1072_p9 = scmp.ne.s32.totalorder %s1063_s7, 0 }
 0x207   : > { %s524_s18 = scalar_lea.sflag [#allocation5], %s523_s10 }
 0x208   : > { %p665_p10 = pnand %p590_p0, %p1072_p9 }
 0x20a   : > { %804 = dma.done.wait (!%p665_p10), %s524_s18, 16  }
 0x20b   : > { %806 = vsyncadd (!%p665_p10), %s524_s18, 4294967280  ;;  %p20_p1 = scmp.ge.s32.totalorder %s892_s25, 4   ;;  %s1073_s20 = smov %s813_s21 }
 0x20c   : > { %s1074_s21 = smov %s817_s22  ;;  %s1075_s22 = smov %s904_s28 }
 0x20d   : > { %s1076_s23 = smov %s892_s25  ;;  %22 = sbr.rel (!%p20_p1) target bundleno = 8 (0x8), region = 94 }
 0x214   :  { %528 = vsyncpa [#allocation4], 1 }
 0x215   :  { %530 = vsyncpa [#allocation4 + $0x1], 1 }
 0x216   :  { %531 = vsyncpa [#allocation7], 1 }
 0x217   :  { %532 = vsyncpa [#allocation5], 1 }
 0x218   :  { %534 = vsyncpa [#allocation5 + $0x1], 1 }

</bundles_post_ra>
